<compile_context>
chip_gen: v7x
topology: tpu7x:2x2x1
jax: 0.10.0
libtpu: 0.0.40
codegen_flags: <defaults>
</compile_context>

<pallas_src>
import jax
import jax.numpy as jnp
from jax import lax
from jax.experimental import pallas as pl
from jax.experimental.pallas import tpu as pltpu


def _fold_subpixel_weights(w_oihw, width, dtype):
    """3x3 conv weights -> block-Toeplitz subpixel weights.

    Returns V of shape (3, (W+2)*Cin, 4*W*Cout) with
      V[r, (jc, ci), (a, j, b, co)] = W_ab[r - a, jc - j - b, ci, co]
    when both tap offsets are in {0, 1}, else 0.  W_ab is the 2x2 kernel on the
    original-resolution (zero-padded) input producing output subpixel
    (2i+a, 2j+b) of conv3x3(nearest_upsample_2x(x)).
    """
    cout, cin = w_oihw.shape[0], w_oihw.shape[1]
    w = jnp.transpose(w_oihw, (2, 3, 1, 0)).astype(jnp.float32)   # (ky, kx, ci, co)

    # Row fold (output-row parity a): padded-input rows {i+a, i+a+1}.
    row_a0 = jnp.stack([w[0], w[1] + w[2]], axis=0)               # (ry, kx, ci, co)
    row_a1 = jnp.stack([w[0] + w[1], w[2]], axis=0)
    wr = jnp.stack([row_a0, row_a1], axis=0)                      # (a, ry, kx, ci, co)
    # Column fold (output-col parity b): padded-input cols {j+b, j+b+1}.
    col_b0 = jnp.stack([wr[:, :, 0], wr[:, :, 1] + wr[:, :, 2]], axis=2)
    col_b1 = jnp.stack([wr[:, :, 0] + wr[:, :, 1], wr[:, :, 2]], axis=2)
    wf = jnp.stack([col_b0, col_b1], axis=1)                      # (a, b, ry, rx, ci, co)

    wp = width + 2
    ry3 = jnp.arange(3)
    a = jnp.arange(2)
    b = jnp.arange(2)
    j = jnp.arange(width)
    jc = jnp.arange(wp)

    ry = ry3[:, None] - a[None, :]                                   # (3, 2)
    rx = jc[:, None, None] - j[None, :, None] - b[None, None, :]     # (wp, W, 2)
    valid = (((ry >= 0) & (ry <= 1))[:, None, :, None, None]
             & ((rx >= 0) & (rx <= 1))[None, :, None, :, :])         # (3, wp, 2, W, 2)

    A = a[None, None, :, None, None]
    B = b[None, None, None, None, :]
    RY = jnp.clip(ry, 0, 1)[:, None, :, None, None]
    RX = jnp.clip(rx, 0, 1)[None, :, None, :, :]
    v = wf[A, B, RY, RX]                                  # (3, wp, 2, W, 2, ci, co)
    v = v * valid[..., None, None].astype(v.dtype)
    # K order = (row_tap, col, cin); N order = (a, j, b, cout)
    v = jnp.transpose(v, (0, 1, 5, 2, 3, 4, 6))           # (3, wp, ci, a, W, b, co)
    return v.reshape(3, wp * cin, 2 * width * 2 * cout).astype(dtype)


def _pick_m_tile(m_total, target):
    """Largest multiple-of-8 tile dividing m_total, <= target, preferring >=2 steps."""
    best = None
    for tm in range(8, min(m_total, target) + 1, 8):
        if m_total % tm == 0:
            best = tm
    if best is None:
        return m_total                      # full-extent block (still legal)
    if m_total // best < 2:                 # keep >=2 grid steps for v7x megacore
        for tm in range(best - 8, 0, -8):
            if m_total % tm == 0 and m_total // tm >= 2:
                return tm
    return best


def subpixel_conv_kernel(x_ref, v_ref, b_ref, o_ref):
    """One M-tile of conv3x3(nearest2x(x)) as a single MXU matmul.

    x_ref: (tm, K_pad)      im2col rows: 3 vertically-shifted padded rows in lanes
    v_ref: (K_pad, 4*W*Cout) stacked block-Toeplitz weights (VMEM-resident)
    b_ref: (1, 4*W*Cout)    bias tiled over (a, j, b), f32
    o_ref: (tm, 4*W*Cout)   lane-dense output slab, (a, j, b, cout) lane order
    """
    acc = jnp.dot(x_ref[...], v_ref[...], preferred_element_type=jnp.float32)
    o_ref[...] = (acc + b_ref[...]).astype(o_ref.dtype)


def lastconv_modified_forward(x_nchw, w_oihw, bias, *, m_tile_target=256,
                              compute_dtype=None):
    """x_nchw: (N, Cin, H, W); w_oihw: (Cout, Cin, 3, 3); bias: (Cout,)."""
    n, cin, h, w = x_nchw.shape
    cout = w_oihw.shape[0]
    dtype = compute_dtype if compute_dtype is not None else x_nchw.dtype

    wc = (w + 2) * cin                       # lanes per padded input row
    k = 3 * wc                               # merged contraction depth
    k_pad = -(-k // 128) * 128               # pad K to a multiple of 128 lanes
    nn = 4 * w * cout                        # output lanes per row-pair (a, j, b, co)
    m_total = n * h

    # ---- glue HBM plumbing (fuses in XLA; no upsampled intermediate) ----
    # NCHW -> NHWC, zero-pad the ORIGINAL resolution by 1, flatten (col, cin) lanes.
    x = jnp.transpose(x_nchw, (0, 2, 3, 1))
    xp = jnp.pad(x, ((0, 0), (1, 1), (1, 1), (0, 0)))
    xp = xp.reshape(n, h + 2, wc).astype(dtype)
    # im2col over rows: slab i = rows [i, i+1, i+2] concatenated along lanes.
    xs = jnp.concatenate([xp[:, r:r + h, :] for r in range(3)], axis=-1)
    xs = jnp.pad(xs, ((0, 0), (0, 0), (0, k_pad - k)))
    xs = xs.reshape(m_total, k_pad)

    v = _fold_subpixel_weights(w_oihw, w, dtype).reshape(k, nn)
    v = jnp.pad(v, ((0, k_pad - k), (0, 0)))
    bias_row = jnp.tile(bias.astype(jnp.float32), 4 * w).reshape(1, nn)

    tm = _pick_m_tile(m_total, m_tile_target)
    grid = (m_total // tm,)

    out_rows = pl.pallas_call(
        subpixel_conv_kernel,
        out_shape=jax.ShapeDtypeStruct((m_total, nn), x_nchw.dtype),
        grid_spec=pltpu.PrefetchScalarGridSpec(
            num_scalar_prefetch=0,
            grid=grid,
            in_specs=[
                pl.BlockSpec((tm, k_pad), lambda m: (m, 0)),
                pl.BlockSpec((k_pad, nn), lambda m: (0, 0)),   # VMEM-resident
                pl.BlockSpec((1, nn), lambda m: (0, 0)),       # VMEM-resident
            ],
            out_specs=pl.BlockSpec((tm, nn), lambda m: (m, 0)),
        ),
        compiler_params=pltpu.CompilerParams(
            dimension_semantics=("parallel",)),
    )(xs, v, bias_row)

    # (n*h, (a, j, b, co)) -> (n, 2h, 2w, cout): pure metadata reshape, then NCHW.
    out = out_rows.reshape(n, 2 * h, 2 * w, cout)
    return jnp.transpose(out, (0, 3, 1, 2))


def reference_forward(x_nchw, w_oihw, bias):
    """Pure-JAX reference (nearest 2x upsample + SAME 3x3 conv) for validation."""
    x = jnp.transpose(x_nchw, (0, 2, 3, 1))
    up = jnp.repeat(jnp.repeat(x, 2, axis=1), 2, axis=2)
    w_hwio = jnp.transpose(w_oihw, (2, 3, 1, 0))
    out = lax.conv_general_dilated(
        up, w_hwio, window_strides=(1, 1), padding="SAME",
        dimension_numbers=("NHWC", "HWIO", "NHWC"))
    out = out + bias[None, None, None, :]
    return jnp.transpose(out, (0, 3, 1, 2))


if __name__ == "__main__":
    # Small shapes consistent with the module: N=2, inp=4, oup=8, spatial 16x16.
    n, cin, cout, h, w = 2, 4, 8, 16, 16

    key = jax.random.PRNGKey(0)
    kx, kw, kb = jax.random.split(key, 3)
    x = jax.random.normal(kx, (n, cin, h, w), dtype=jnp.float32)
    # Deterministic synthetic Conv2d params (shapes per nn.Conv2d(inp, oup, 3, 1, 1)).
    fan_in = cin * 3 * 3
    bound = 1.0 / (fan_in ** 0.5)
    wt = jax.random.uniform(kw, (cout, cin, 3, 3), jnp.float32, -bound, bound)
    b = jax.random.uniform(kb, (cout,), jnp.float32, -bound, bound)

    fwd = jax.jit(lastconv_modified_forward)
    out = jax.block_until_ready(fwd(x, wt, b))
    ref = jax.block_until_ready(reference_forward(x, wt, b))

    assert out.shape == (n, cout, 2 * h, 2 * w), out.shape
    max_err = float(jnp.max(jnp.abs(out - ref)))
    assert jnp.allclose(out, ref, atol=1e-4, rtol=1e-4), max_err
    print("KERNEL_OK")
</pallas_src>

<mosaic_0001>
module attributes {stable_mosaic.version = 11 : i64} {
  func.func @subpixel_conv_kernel(%arg0: i32, %arg1: memref<16x256xf32, #tpu.memory_space<vmem>>, %arg2: memref<256x512xf32, #tpu.memory_space<vmem>>, %arg3: memref<1x512xf32, #tpu.memory_space<vmem>>, %arg4: memref<16x512xf32, #tpu.memory_space<vmem>>) attributes {dimension_semantics = [#tpu.dimension_semantics<parallel>], iteration_bounds = array<i64: 2>, scalar_prefetch = 0 : i64, scratch_operands = 0 : i64, tpu.core_type = #tpu.core_type<tc>, window_params = [{transform_indices = @transform_0, window_bounds = array<i64: 16, 256>}, {pipeline_mode = #tpu.pipeline_mode<synchronous>, transform_indices = @transform_1, window_bounds = array<i64: 256, 512>}, {pipeline_mode = #tpu.pipeline_mode<synchronous>, transform_indices = @transform_2, window_bounds = array<i64: 1, 512>}, {transform_indices = @transform_3, window_bounds = array<i64: 16, 512>}]} {
    %c0 = arith.constant 0 : index
    %c0_0 = arith.constant 0 : index
    %0 = vector.load %arg1[%c0, %c0_0] : memref<16x256xf32, #tpu.memory_space<vmem>>, vector<16x256xf32>
    %c0_1 = arith.constant 0 : index
    %c0_2 = arith.constant 0 : index
    %1 = vector.load %arg2[%c0_1, %c0_2] : memref<256x512xf32, #tpu.memory_space<vmem>>, vector<256x512xf32>
    %cst = arith.constant dense<0.000000e+00> : vector<16x512xf32>
    %2 = tpu.matmul %0, %1, %cst {dimension_numbers = #tpu.dot_dimension_numbers<[1], [0], [0], [1], [0, 0, 1, 1], [], []>} : vector<16x256xf32>, vector<256x512xf32>, vector<16x512xf32> -> vector<16x512xf32>
    %c0_3 = arith.constant 0 : index
    %c0_4 = arith.constant 0 : index
    %3 = vector.load %arg3[%c0_3, %c0_4] : memref<1x512xf32, #tpu.memory_space<vmem>>, vector<1x512xf32>
    %4 = vector.broadcast %3 : vector<1x512xf32> to vector<16x512xf32>
    %5 = arith.addf %2, %4 : vector<16x512xf32>
    %c0_5 = arith.constant 0 : index
    %c0_6 = arith.constant 0 : index
    %6 = vector.load %arg4[%c0_5, %c0_6] : memref<16x512xf32, #tpu.memory_space<vmem>>, vector<16x512xf32>
    tpu.vector_store %arg4[%c0_5, %c0_6], %5 {strides = array<i32>} : memref<16x512xf32, #tpu.memory_space<vmem>>, vector<16x512xf32>,
    return
  }
  func.func @transform_0(%arg0: i32) -> (i32, i32) {
    %c0_i32 = arith.constant 0 : i32
    %c0_i32_0 = arith.constant 0 : i32
    return %arg0, %c0_i32 : i32, i32
  }
  func.func @transform_1(%arg0: i32) -> (i32, i32) {
    %c0_i32 = arith.constant 0 : i32
    %c0_i32_0 = arith.constant 0 : i32
    %c0_i32_1 = arith.constant 0 : i32
    return %c0_i32, %c0_i32_0 : i32, i32
  }
  func.func @transform_2(%arg0: i32) -> (i32, i32) {
    %c0_i32 = arith.constant 0 : i32
    %c0_i32_0 = arith.constant 0 : i32
    %c0_i32_1 = arith.constant 0 : i32
    return %c0_i32, %c0_i32_0 : i32, i32
  }
  func.func @transform_3(%arg0: i32) -> (i32, i32) {
    %c0_i32 = arith.constant 0 : i32
    %c0_i32_0 = arith.constant 0 : i32
    return %arg0, %c0_i32 : i32, i32
  }
}

</mosaic_0001>

<bundles_post_ra>
// kernel: tile.8
= control target key start
LH: loop header
LB: loop body
LE: loop exit
PB: predicated region body
PF: predicated region fallthrough
CT: control target
= control target key end

     0   :  { %s64_s0 = inlined_call_operand.vmem [shape: f32[8], index: 0, kind: input, shape index: {}]   ;;  %s65_s1 = inlined_call_operand.vmem [shape: f32[64,8], index: 1, kind: output, shape index: {}]  }
   0x1   :  { %v4_v0 = vld [vmem:[%s64_s0] ss:$0 sm:$0xff] }
   0x2   :  { %5 = vst [vmem:[%s65_s1] sm:$0xff] %v4_v0  ;;  %20 = vst [vmem:[%s65_s1 + $0x8] sm:$0xff] %v4_v0 }
   0x3   :  { %21 = vst [vmem:[%s65_s1 + $0x10] sm:$0xff] %v4_v0  ;;  %22 = vst [vmem:[%s65_s1 + $0x18] sm:$0xff] %v4_v0 }
   0x4   :  { %23 = vst [vmem:[%s65_s1 + $0x20] sm:$0xff] %v4_v0  ;;  %24 = vst [vmem:[%s65_s1 + $0x28] sm:$0xff] %v4_v0 }
   0x5   :  { %25 = vst [vmem:[%s65_s1 + $0x30] sm:$0xff] %v4_v0  ;;  %26 = vst [vmem:[%s65_s1 + $0x38] sm:$0xff] %v4_v0 }

// kernel: tile.9
= control target key start
LH: loop header
LB: loop body
LE: loop exit
PB: predicated region body
PF: predicated region fallthrough
CT: control target
= control target key end

     0   :  { %vm6_vm0 = vcmask 1043458   ;;  %s11_s6 = smov 3  ;;  %s14_s7 = smov 12  ;;  %vm8_vm1 = vcmask 64512   ;;  %vm20_vm2 = vcmask 1048512   ;;  %vm32_vm3 = vcmask 982912   ;;  %s412_s0 = inlined_call_operand.vmem [shape: f32[64,8], index: 0, kind: input, shape index: {}]   ;;  %s413_s1 = inlined_call_operand.vmem [shape: f32[1,512], index: 1, kind: output, shape index: {}]  }
   0x1   :  { %v215_v0 = vld [vmem:[%s412_s0 + $0xf] ss:$16 sm:%s11_s6]   ;;  %s35_s12 = smov 3  ;;  %s38_s15 = smov 12  ;;  %vm44_vm4 = vcmask 917312   ;;  %vm56_vm5 = vcmask 851712  }
   0x2   :  { %v216_v1 = vld [vmem:[%s412_s0 + $0xf] ss:$16 sm:%s14_s7]   ;;  %v219_v3 = vld [vmem:[%s412_s0 + $0xd] ss:$16 sm:%s35_s12]   ;;  %s263_s16 = smov 120   ;;  %s23_s19 = smov 3 }
   0x3   :  { %v17_v2 = vsel %vm6_vm0, %v216_v1, %v215_v0  ;;  %v220_v4 = vld [vmem:[%s412_s0 + $0xd] ss:$16 sm:%s38_s15]   ;;  %s26_s20 = smov 12  ;;  %v217_v6 = vld [vmem:[%s412_s0 + $0xe] ss:$16 sm:%s23_s19]   ;;  %s47_s25 = smov 3 }
   0x4   :  { %18 = vrot.lane.b32.xlu0 %v17_v2, %s263_s16  ;;  %v41_v5 = vsel %vm6_vm0, %v220_v4, %v219_v3  ;;  %v218_v7 = vld [vmem:[%s412_s0 + $0xe] ss:$16 sm:%s26_s20]   ;;  %s264_s26 = smov 104   ;;  %s50_s29 = smov 12  ;;  %vm68_vm6 = vcmask 786112   ;;  %vm80_vm7 = vcmask 720512  }
   0x5   :  { %42 = vrot.lane.b32.xlu1 %v41_v5, %s264_s26  ;;  %v29_v8 = vsel %vm6_vm0, %v218_v7, %v217_v6  ;;  %v221_v9 = vld [vmem:[%s412_s0 + $0xc] ss:$16 sm:%s47_s25]   ;;  %s59_s3 = smov 3  ;;  %s62_s4 = smov 12  ;;  %vm92_vm8 = vcmask 654912   ;;  %vm104_vm9 = vcmask 589312  }
   0x6   :  { %v222_v10 = vld [vmem:[%s412_s0 + $0xc] ss:$16 sm:%s50_s29]   ;;  %s265_s5 = smov 112   ;;  %v223_v12 = vld [vmem:[%s412_s0 + $0xb] ss:$16 sm:%s59_s3]   ;;  %s71_s8 = smov 3 }
   0x7   :  { %v53_v11 = vsel %vm6_vm0, %v222_v10, %v221_v9  ;;  %v224_v13 = vld [vmem:[%s412_s0 + $0xb] ss:$16 sm:%s62_s4]   ;;  %v225_v14 = vld [vmem:[%s412_s0 + $0xa] ss:$16 sm:%s71_s8]   ;;  %s74_s13 = smov 12  ;;  %s266_s14 = smov 96  }
   0x8   :  { %30 = vrot.lane.b32.xlu0 %v29_v8, %s265_s5  ;;  %v65_v15 = vsel %vm6_vm0, %v224_v13, %v223_v12  ;;  %v226_v16 = vld [vmem:[%s412_s0 + $0xa] ss:$16 sm:%s74_s13]   ;;  %s83_s17 = smov 3  ;;  %s86_s18 = smov 12  ;;  %vm116_vm10 = vcmask 523712   ;;  %vm128_vm11 = vcmask 458112  }
   0x9   :  { %54 = vrot.lane.b32.xlu1 %v53_v11, %s266_s14  ;;  %v77_v17 = vsel %vm6_vm0, %v226_v16, %v225_v14  ;;  %v227_v18 = vld [vmem:[%s412_s0 + $0x9] ss:$16 sm:%s83_s17]   ;;  %s95_s23 = smov 3  ;;  %s267_s24 = smov 88   ;;  %vm140_vm12 = vcmask 392512   ;;  %vm152_vm13 = vcmask 326912  }
   0xa   :  { %v228_v19 = vld [vmem:[%s412_s0 + $0x9] ss:$16 sm:%s86_s18]   ;;  %v229_v20 = vld [vmem:[%s412_s0 + $0x8] ss:$16 sm:%s95_s23]   ;;  %s98_s27 = smov 12  ;;  %s107_s30 = smov 3 }
   0xb   :  { %v89_v21 = vsel %vm6_vm0, %v228_v19, %v227_v18  ;;  %v230_v22 = vld [vmem:[%s412_s0 + $0x8] ss:$16 sm:%s98_s27]   ;;  %s110_s2 = smov 12  ;;  %s268_s3 = smov 80   ;;  %v231_v23 = vld [vmem:[%s412_s0 + $0x7] ss:$16 sm:%s107_s30]  }
   0xc   :  { %66 = vrot.lane.b32.xlu0 %v65_v15, %s267_s24  ;;  %s119_s6 = smov 3  ;;  %v101_v24 = vsel %vm6_vm0, %v230_v22, %v229_v20  ;;  %v232_v25 = vld [vmem:[%s412_s0 + $0x7] ss:$16 sm:%s110_s2]   ;;  %s122_s11 = smov 12  ;;  %vm164_vm14 = vcmask 261312   ;;  %vm176_vm15 = vcmask 195712  }
   0xd   :  { %78 = vrot.lane.b32.xlu1 %v77_v17, %s268_s3  ;;  %v233_v26 = vld [vmem:[%s412_s0 + $0x6] ss:$16 sm:%s119_s6]   ;;  %s269_s12 = smov 72   ;;  %s131_s15 = smov 3  ;;  %v113_v28 = vsel %vm6_vm0, %v232_v25, %v231_v23 }
   0xe   :  { %v234_v27 = vld [vmem:[%s412_s0 + $0x6] ss:$16 sm:%s122_s11]   ;;  %s134_s16 = smov 12  ;;  %v235_v29 = vld [vmem:[%s412_s0 + $0x5] ss:$16 sm:%s131_s15]   ;;  %s143_s19 = smov 3 }
   0xf   :  { %s270_s20 = smov 64   ;;  %v236_v30 = vld [vmem:[%s412_s0 + $0x5] ss:$16 sm:%s134_s16]   ;;  %s146_s23 = smov 12  ;;  %v125_v31 = vsel %vm6_vm0, %v234_v27, %v233_v26  ;;  %v237_v32 = vld [vmem:[%s412_s0 + $0x4] ss:$16 sm:%s143_s19]  }
  0x10   :  { %90 = vrot.lane.b32.xlu0 %v89_v21, %s269_s12  ;;  %s155_s26 = smov 3  ;;  %s158_s27 = smov 12  ;;  %v238_v33 = vld [vmem:[%s412_s0 + $0x4] ss:$16 sm:%s146_s23]   ;;  %v137_v34 = vsel %vm6_vm0, %v236_v30, %v235_v29 }
  0x11   :  { %102 = vrot.lane.b32.xlu1 %v101_v24, %s270_s20  ;;  %s271_s28 = smov 56   ;;  %s167_s2 = smov 3  ;;  %v239_v35 = vld [vmem:[%s412_s0 + $0x3] ss:$16 sm:%s155_s26]   ;;  %v149_v37 = vsel %vm6_vm0, %v238_v33, %v237_v32 }
  0x12   :  { %s170_s5 = smov 12  ;;  %s272_s6 = smov 48   ;;  %v240_v36 = vld [vmem:[%s412_s0 + $0x3] ss:$16 sm:%s158_s27]   ;;  %v241_v38 = vld [vmem:[%s412_s0 + $0x2] ss:$16 sm:%s167_s2]  }
  0x13   :  { %s179_s9 = smov 3  ;;  %v242_v39 = vld [vmem:[%s412_s0 + $0x2] ss:$16 sm:%s170_s5]   ;;  %s182_s14 = smov 12  ;;  %v161_v41 = vsel %vm6_vm0, %v240_v36, %v239_v35 }
  0x14   :  { %114 = vrot.lane.b32.xlu0 %v113_v28, %s271_s28  ;;  %s2_s15 = smov 3  ;;  %s273_s16 = smov 40   ;;  %v243_v42 = vld [vmem:[%s412_s0 + $0x1] ss:$16 sm:%s179_s9]   ;;  %v173_v46 = vsel %vm6_vm0, %v242_v39, %v241_v38 }
  0x15   :  { %126 = vrot.lane.b32.xlu1 %v125_v31, %s272_s6  ;;  %v3_v40 = vld [vmem:[%s412_s0] ss:$16 sm:%s2_s15]   ;;  %s4_s19 = smov 12  ;;  %s274_s24 = smov 32  }
  0x16   :  { %v5_v43 = vld [vmem:[%s412_s0] ss:$16 sm:%s4_s19]   ;;  %v244_v44 = vld [vmem:[%s412_s0 + $0x1] ss:$16 sm:%s182_s14]   ;;  %s275_s0 = smov 24   ;;  %s276_s27 = smov 16  }
  0x17   :  { %v7_v45 = vsel %vm6_vm0, %v5_v43, %v3_v40  ;;  %v185_v47 = vsel %vm6_vm0, %v244_v44, %v243_v42  ;;  %s277_s28 = smov 8   ;;  %vm188_vm0 = vcmask 130112  }
  0x18   :  { %138 = vrot.lane.b32.xlu0 %v137_v34, %s273_s16  ;;  %9 = vst.msk [vmem:[#allocation0] ss:$8 sm:$0xf] %vm8_vm1, %v7_v45  }
  0x19   :  { %150 = vrot.lane.b32.xlu1 %v149_v37, %s274_s24 }
  0x1c   :  { %162 = vrot.lane.b32.xlu0 %v161_v41, %s275_s0 }
  0x1d   :  { %174 = vrot.lane.b32.xlu1 %v173_v46, %s276_s27 }
  0x20   :  { %186 = vrot.lane.b32.xlu0 %v185_v47, %s277_s28 }
  0x76   :  { %v19_v48 = vpop.permute.xlu0 %18  }
  0x77   :  { %21 = vst.msk [vmem:[#allocation0] ss:$8 sm:$0xf] %vm20_vm2, %v19_v48   ;;  %v43_v49 = vpop.permute.xlu1 %42  }
  0x7a   :  { %v31_v50 = vpop.permute.xlu0 %30  }
  0x7b   :  { %33 = vst.msk [vmem:[#allocation0] ss:$8 sm:$0xf] %vm32_vm3, %v31_v50   ;;  %v55_v51 = vpop.permute.xlu1 %54  }
  0x7c   :  { %45 = vst.msk [vmem:[#allocation0] ss:$8 sm:$0xf] %vm44_vm4, %v43_v49  }
  0x7d   :  { %57 = vst.msk [vmem:[#allocation0] ss:$8 sm:$0xf] %vm56_vm5, %v55_v51  }
  0x7e   :  { %v67_v52 = vpop.permute.xlu0 %66  }
  0x7f   :  { %69 = vst.msk [vmem:[#allocation0] ss:$8 sm:$0xf] %vm68_vm6, %v67_v52   ;;  %v79_v53 = vpop.permute.xlu1 %78  }
  0x80   :  { %81 = vst.msk [vmem:[#allocation0] ss:$8 sm:$0xf] %vm80_vm7, %v79_v53  }
  0x82   :  { %v91_v54 = vpop.permute.xlu0 %90  }
  0x83   :  { %93 = vst.msk [vmem:[#allocation0] ss:$8 sm:$0xf] %vm92_vm8, %v91_v54   ;;  %v103_v55 = vpop.permute.xlu1 %102  }
  0x84   :  { %105 = vst.msk [vmem:[#allocation0] ss:$8 sm:$0xf] %vm104_vm9, %v103_v55  }
  0x86   :  { %v115_v56 = vpop.permute.xlu0 %114  }
  0x87   :  { %117 = vst.msk [vmem:[#allocation0] ss:$8 sm:$0xf] %vm116_vm10, %v115_v56   ;;  %v127_v57 = vpop.permute.xlu1 %126  }
  0x88   :  { %129 = vst.msk [vmem:[#allocation0] ss:$8 sm:$0xf] %vm128_vm11, %v127_v57  }
  0x8a   :  { %v139_v58 = vpop.permute.xlu0 %138  }
  0x8b   :  { %141 = vst.msk [vmem:[#allocation0] ss:$8 sm:$0xf] %vm140_vm12, %v139_v58   ;;  %v151_v59 = vpop.permute.xlu1 %150  }
  0x8c   :  { %153 = vst.msk [vmem:[#allocation0] ss:$8 sm:$0xf] %vm152_vm13, %v151_v59  }
  0x8e   :  { %v163_v60 = vpop.permute.xlu0 %162  }
  0x8f   :  { %165 = vst.msk [vmem:[#allocation0] ss:$8 sm:$0xf] %vm164_vm14, %v163_v60   ;;  %v175_v61 = vpop.permute.xlu1 %174  }
  0x90   :  { %177 = vst.msk [vmem:[#allocation0] ss:$8 sm:$0xf] %vm176_vm15, %v175_v61  }
  0x92   :  { %v187_v62 = vpop.permute.xlu0 %186  }
  0x93   :  { %189 = vst.msk [vmem:[#allocation0] ss:$8 sm:$0xf] %vm188_vm0, %v187_v62  }
  0x9a   :  { %v193_v63 = vld [vmem:[#allocation0] sm:$0x1]  ;;  %v197_v0 = vld [vmem:[#allocation0 + $0x8] sm:$0x1]  ;;  %v202_v1 = vld [vmem:[#allocation0 + $0x10] sm:$0x1] }
  0x9b   :  { %195 = vst [vmem:[%s413_s1] sm:$0x1] %v193_v63  ;;  %245 = vst [vmem:[%s413_s1 + $0x1] sm:$0x1] %v197_v0  ;;  %v208_v2 = vld [vmem:[#allocation0 + $0x18] sm:$0x1] }
  0x9c   :  { %246 = vst [vmem:[%s413_s1 + $0x2] sm:$0x1] %v202_v1  ;;  %247 = vst [vmem:[%s413_s1 + $0x3] sm:$0x1] %v208_v2 }

// kernel: lastconv_modified_forward.1
= control target key start
LH: loop header
LB: loop body
LE: loop exit
PB: predicated region body
PF: predicated region fallthrough
CT: control target
= control target key end

     0   :  { %s732_s12 = smov 0   ;;  %s1149_s0 = inlined_call_operand.vmem [shape: f32[32,256], index: 0, kind: input, shape index: {}]   ;;  %s1150_s1 = inlined_call_operand.vmem [shape: f32[256,512], index: 1, kind: input, shape index: {}]   ;;  %s1151_s2 = inlined_call_operand.vmem [shape: f32[1,512], index: 2, kind: input, shape index: {}]   ;;  %s1152_s3 = inlined_call_operand.vmem [shape: f32[32,512], index: 3, kind: output, shape index: {}]  }
   0x1 LB: > { %s553_s13 = sadd.s32 4294967295, %s710_s12   ;;  %p557_p0 = scmp.ge.s32.totalorder %s710_s12, 1  ;;  %s710_s12 = sphi %s732_s12, %s13_s12  }
   0x2   : > { %p139_p1 = scmp.lt.s32.totalorder %s710_s12, 3 }
   0x4   : > { %p140_p2 = pnand %p557_p0, %p139_p1 }
   0x5   : > { %v184_v0 = vld [vmem:[%s1150_s1 + $0x8] sm:$0xff] (!%p140_p2)  ;;  %v186_v2 = vld [vmem:[%s1150_s1 + $0x18] sm:$0xff] (!%p140_p2)  ;;  %v183_v5 = vld [vmem:[%s1150_s1] sm:$0xff] (!%p140_p2)  ;;  %s558_s15 = sshll.u32 (!%p140_p2), %s553_s13, 1 }
   0x6   : > { %143 = sbr.rel (%p140_p2) target bundleno = 294 (0x126), region = 32  ;;  %v188_v1 = vld [vmem:[%s1150_s1 + $0x28] sm:$0xff] (!%p140_p2)  ;;  %v190_v4 = vld [vmem:[%s1150_s1 + $0x38] sm:$0xff] (!%p140_p2)  ;;  %v187_v6 = vld [vmem:[%s1150_s1 + $0x20] sm:$0xff] (!%p140_p2)  ;;  %p166_p3 = scmp.lt.s32.totalorder (!%p140_p2), %s558_s15, 3 }
   0x7   : > { %v568_v3 = vpack.c.bf16 (!%p140_p2), %v188_v1, %v184_v0  ;;  %v632_v7 = vpack.c.bf16 (!%p140_p2), %v190_v4, %v186_v2  ;;  %v570_v8 = vpack.c.bf16 (!%p140_p2), %v187_v6, %v183_v5  ;;  %v185_v9 = vld [vmem:[%s1150_s1 + $0x10] sm:$0xff] (!%p140_p2)  ;;  %v192_v11 = vld [vmem:[%s1150_s1 + $0x48] sm:$0xff] (!%p140_p2)  ;;  %v194_v14 = vld [vmem:[%s1150_s1 + $0x58] sm:$0xff] (!%p140_p2) }
   0x8   : > { %v189_v10 = vld [vmem:[%s1150_s1 + $0x30] sm:$0xff] (!%p140_p2)  ;;  %v196_v13 = vld [vmem:[%s1150_s1 + $0x68] sm:$0xff] (!%p140_p2)  ;;  %v198_v15 = vld [vmem:[%s1150_s1 + $0x78] sm:$0xff] (!%p140_p2) }
   0x9   : > { %569 = vmatprep.subr.bf16.mxu0 (!%p140_p2), %v568_v3  ;;  %v634_v12 = vpack.c.bf16 (!%p140_p2), %v189_v10, %v185_v9  ;;  %633 = vmatprep.subr.bf16.mxu1 (!%p140_p2), %v632_v7  ;;  %v572_v16 = vpack.c.bf16 (!%p140_p2), %v196_v13, %v192_v11  ;;  %v636_v17 = vpack.c.bf16 (!%p140_p2), %v198_v15, %v194_v14  ;;  %v191_v18 = vld [vmem:[%s1150_s1 + $0x40] sm:$0xff] (!%p140_p2)  ;;  %v193_v20 = vld [vmem:[%s1150_s1 + $0x50] sm:$0xff] (!%p140_p2)  ;;  %v200_v23 = vld [vmem:[%s1150_s1 + $0x88] sm:$0xff] (!%p140_p2) }
   0xa   : > { %571 = vmatpush1.bf16.msra.mxu0 (!%p140_p2), %v570_v8  ;;  %v195_v19 = vld [vmem:[%s1150_s1 + $0x60] sm:$0xff] (!%p140_p2)  ;;  %v197_v22 = vld [vmem:[%s1150_s1 + $0x70] sm:$0xff] (!%p140_p2)  ;;  %v204_v24 = vld [vmem:[%s1150_s1 + $0xa8] sm:$0xff] (!%p140_p2) }
   0xb   : > { %635 = vmatpush1.bf16.msra.mxu1 (!%p140_p2), %v634_v12  ;;  %v574_v21 = vpack.c.bf16 (!%p140_p2), %v195_v19, %v191_v18  ;;  %573 = vmatprep.subr.bf16.mxu0 (!%p140_p2), %v572_v16  ;;  %v638_v25 = vpack.c.bf16 (!%p140_p2), %v197_v22, %v193_v20  ;;  %v576_v26 = vpack.c.bf16 (!%p140_p2), %v204_v24, %v200_v23  ;;  %v202_v27 = vld [vmem:[%s1150_s1 + $0x98] sm:$0xff] (!%p140_p2)  ;;  %v199_v29 = vld [vmem:[%s1150_s1 + $0x80] sm:$0xff] (!%p140_p2)  ;;  %v201_v32 = vld [vmem:[%s1150_s1 + $0x90] sm:$0xff] (!%p140_p2) }
   0xc   : > { %637 = vmatprep.subr.bf16.mxu1 (!%p140_p2), %v636_v17  ;;  %v206_v28 = vld [vmem:[%s1150_s1 + $0xb8] sm:$0xff] (!%p140_p2)  ;;  %v203_v31 = vld [vmem:[%s1150_s1 + $0xa0] sm:$0xff] (!%p140_p2)  ;;  %v205_v33 = vld [vmem:[%s1150_s1 + $0xb0] sm:$0xff] (!%p140_p2) }
   0xd   : > { %v640_v30 = vpack.c.bf16 %v206_v28, %v202_v27  ;;  %v578_v34 = vpack.c.bf16 %v203_v31, %v199_v29  ;;  %v208_v35 = vld [vmem:[%s1150_s1 + $0xc8] sm:$0xff]  ;;  %v210_v37 = vld [vmem:[%s1150_s1 + $0xd8] sm:$0xff]  ;;  %v642_v38 = vpack.c.bf16 %v205_v33, %v201_v32  ;;  %v207_v41 = vld [vmem:[%s1150_s1 + $0xc0] sm:$0xff]  ;;  %s1154_s15 = smov (!%p166_p3, %s558_s15), 3 }
   0xe   : > { %575 = vmatpush1.bf16.msra.mxu0 %v574_v21  ;;  %v212_v36 = vld [vmem:[%s1150_s1 + $0xe8] sm:$0xff]  ;;  %v214_v40 = vld [vmem:[%s1150_s1 + $0xf8] sm:$0xff]  ;;  %v211_v42 = vld [vmem:[%s1150_s1 + $0xe0] sm:$0xff]  ;;  %s566_s5 = sshll.u32 %s1154_s15, 4  ;;  %s567_s29 = sshll.u32 %s1154_s15, 5 }
   0xf   : > { %639 = vmatpush1.bf16.msra.mxu1 %v638_v25  ;;  %577 = vmatprep.subr.bf16.mxu0 %v576_v26  ;;  %v580_v39 = vpack.c.bf16 %v212_v36, %v208_v35  ;;  %v644_v43 = vpack.c.bf16 %v214_v40, %v210_v37  ;;  %v209_v44 = vld [vmem:[%s1150_s1 + $0xd0] sm:$0xff]  ;;  %v216_v46 = vld [vmem:[%s1150_s1 + $0x108] sm:$0xff]  ;;  %v218_v48 = vld [vmem:[%s1150_s1 + $0x118] sm:$0xff]  ;;  %v582_v50 = vpack.c.bf16 %v211_v42, %v207_v41  ;;  %s1025_s26 = scalar_lea.vmem %s1149_s0, %s566_s5  ;;  %s177_s4 = scalar_lea.vmem %s1152_s3, %s567_s29 }
  0x10   : > { %641 = vmatprep.subr.bf16.mxu1 %v640_v30  ;;  %v213_v45 = vld [vmem:[%s1150_s1 + $0xf0] sm:$0xff]  ;;  %v220_v47 = vld [vmem:[%s1150_s1 + $0x128] sm:$0xff]  ;;  %v222_v49 = vld [vmem:[%s1150_s1 + $0x138] sm:$0xff] }
  0x11   : > { %v646_v51 = vpack.c.bf16 %v213_v45, %v209_v44  ;;  %v584_v52 = vpack.c.bf16 %v220_v47, %v216_v46  ;;  %v215_v53 = vld [vmem:[%s1150_s1 + $0x100] sm:$0xff]  ;;  %v217_v55 = vld [vmem:[%s1150_s1 + $0x110] sm:$0xff]  ;;  %v648_v56 = vpack.c.bf16 %v222_v49, %v218_v48  ;;  %v224_v58 = vld [vmem:[%s1150_s1 + $0x148] sm:$0xff] }
  0x12   : > { %579 = vmatpush1.bf16.msra.mxu0 %v578_v34  ;;  %v219_v54 = vld [vmem:[%s1150_s1 + $0x120] sm:$0xff]  ;;  %v221_v57 = vld [vmem:[%s1150_s1 + $0x130] sm:$0xff]  ;;  %v228_v59 = vld [vmem:[%s1150_s1 + $0x168] sm:$0xff] }
  0x13   : > { %643 = vmatpush1.bf16.msra.mxu1 %v642_v38  ;;  %581 = vmatprep.subr.bf16.mxu0 %v580_v39  ;;  %v226_v60 = vld [vmem:[%s1150_s1 + $0x158] sm:$0xff]  ;;  %v586_v62 = vpack.c.bf16 %v219_v54, %v215_v53  ;;  %v650_v63 = vpack.c.bf16 %v221_v57, %v217_v55  ;;  %v588_v0 = vpack.c.bf16 %v228_v59, %v224_v58  ;;  %v223_v1 = vld [vmem:[%s1150_s1 + $0x140] sm:$0xff]  ;;  %v225_v3 = vld [vmem:[%s1150_s1 + $0x150] sm:$0xff] }
  0x14   : > { %645 = vmatprep.subr.bf16.mxu1 %v644_v43  ;;  %v230_v61 = vld [vmem:[%s1150_s1 + $0x178] sm:$0xff]  ;;  %v227_v2 = vld [vmem:[%s1150_s1 + $0x160] sm:$0xff]  ;;  %v229_v5 = vld [vmem:[%s1150_s1 + $0x170] sm:$0xff] }
  0x15   : > { %v652_v4 = vpack.c.bf16 %v230_v61, %v226_v60  ;;  %v232_v6 = vld [vmem:[%s1150_s1 + $0x188] sm:$0xff]  ;;  %v234_v8 = vld [vmem:[%s1150_s1 + $0x198] sm:$0xff]  ;;  %v590_v10 = vpack.c.bf16 %v227_v2, %v223_v1  ;;  %v654_v11 = vpack.c.bf16 %v229_v5, %v225_v3  ;;  %v231_v13 = vld [vmem:[%s1150_s1 + $0x180] sm:$0xff] }
  0x16   : > { %583 = vmatpush1.bf16.msra.mxu0 %v582_v50  ;;  %v236_v7 = vld [vmem:[%s1150_s1 + $0x1a8] sm:$0xff]  ;;  %v238_v9 = vld [vmem:[%s1150_s1 + $0x1b8] sm:$0xff]  ;;  %v235_v14 = vld [vmem:[%s1150_s1 + $0x1a0] sm:$0xff] }
  0x17   : > { %647 = vmatpush1.bf16.msra.mxu1 %v646_v51  ;;  %585 = vmatprep.subr.bf16.mxu0 %v584_v52  ;;  %v592_v12 = vpack.c.bf16 %v236_v7, %v232_v6  ;;  %v233_v15 = vld [vmem:[%s1150_s1 + $0x190] sm:$0xff]  ;;  %v656_v16 = vpack.c.bf16 %v238_v9, %v234_v8  ;;  %v240_v18 = vld [vmem:[%s1150_s1 + $0x1c8] sm:$0xff]  ;;  %v242_v20 = vld [vmem:[%s1150_s1 + $0x1d8] sm:$0xff]  ;;  %v594_v22 = vpack.c.bf16 %v235_v14, %v231_v13 }
  0x18   : > { %649 = vmatprep.subr.bf16.mxu1 %v648_v56  ;;  %v237_v17 = vld [vmem:[%s1150_s1 + $0x1b0] sm:$0xff]  ;;  %v244_v19 = vld [vmem:[%s1150_s1 + $0x1e8] sm:$0xff]  ;;  %v246_v21 = vld [vmem:[%s1150_s1 + $0x1f8] sm:$0xff] }
  0x19   : > { %v658_v23 = vpack.c.bf16 %v237_v17, %v233_v15  ;;  %v596_v24 = vpack.c.bf16 %v244_v19, %v240_v18  ;;  %v239_v25 = vld [vmem:[%s1150_s1 + $0x1c0] sm:$0xff]  ;;  %v241_v27 = vld [vmem:[%s1150_s1 + $0x1d0] sm:$0xff]  ;;  %v660_v28 = vpack.c.bf16 %v246_v21, %v242_v20  ;;  %v248_v30 = vld [vmem:[%s1150_s1 + $0x208] sm:$0xff] }
  0x1a   : > { %587 = vmatpush1.bf16.msra.mxu0 %v586_v62  ;;  %v243_v26 = vld [vmem:[%s1150_s1 + $0x1e0] sm:$0xff]  ;;  %v245_v29 = vld [vmem:[%s1150_s1 + $0x1f0] sm:$0xff]  ;;  %v252_v31 = vld [vmem:[%s1150_s1 + $0x228] sm:$0xff] }
  0x1b   : > { %651 = vmatpush1.bf16.msra.mxu1 %v650_v63  ;;  %589 = vmatprep.subr.bf16.mxu0 %v588_v0  ;;  %v250_v32 = vld [vmem:[%s1150_s1 + $0x218] sm:$0xff]  ;;  %v598_v34 = vpack.c.bf16 %v243_v26, %v239_v25  ;;  %v662_v35 = vpack.c.bf16 %v245_v29, %v241_v27  ;;  %v600_v36 = vpack.c.bf16 %v252_v31, %v248_v30  ;;  %v247_v37 = vld [vmem:[%s1150_s1 + $0x200] sm:$0xff]  ;;  %v249_v39 = vld [vmem:[%s1150_s1 + $0x210] sm:$0xff] }
  0x1c   : > { %653 = vmatprep.subr.bf16.mxu1 %v652_v4  ;;  %v254_v33 = vld [vmem:[%s1150_s1 + $0x238] sm:$0xff]  ;;  %v251_v38 = vld [vmem:[%s1150_s1 + $0x220] sm:$0xff]  ;;  %v253_v41 = vld [vmem:[%s1150_s1 + $0x230] sm:$0xff] }
  0x1d   : > { %v664_v40 = vpack.c.bf16 %v254_v33, %v250_v32  ;;  %v256_v42 = vld [vmem:[%s1150_s1 + $0x248] sm:$0xff]  ;;  %v258_v44 = vld [vmem:[%s1150_s1 + $0x258] sm:$0xff]  ;;  %v602_v46 = vpack.c.bf16 %v251_v38, %v247_v37  ;;  %v666_v47 = vpack.c.bf16 %v253_v41, %v249_v39  ;;  %v255_v49 = vld [vmem:[%s1150_s1 + $0x240] sm:$0xff] }
  0x1e   : > { %591 = vmatpush1.bf16.msra.mxu0 %v590_v10  ;;  %v260_v43 = vld [vmem:[%s1150_s1 + $0x268] sm:$0xff]  ;;  %v262_v45 = vld [vmem:[%s1150_s1 + $0x278] sm:$0xff]  ;;  %v259_v50 = vld [vmem:[%s1150_s1 + $0x260] sm:$0xff] }
  0x1f   : > { %655 = vmatpush1.bf16.msra.mxu1 %v654_v11  ;;  %593 = vmatprep.subr.bf16.mxu0 %v592_v12  ;;  %v604_v48 = vpack.c.bf16 %v260_v43, %v256_v42  ;;  %v257_v51 = vld [vmem:[%s1150_s1 + $0x250] sm:$0xff]  ;;  %v668_v52 = vpack.c.bf16 %v262_v45, %v258_v44  ;;  %v264_v54 = vld [vmem:[%s1150_s1 + $0x288] sm:$0xff]  ;;  %v266_v56 = vld [vmem:[%s1150_s1 + $0x298] sm:$0xff]  ;;  %v606_v58 = vpack.c.bf16 %v259_v50, %v255_v49 }
  0x20   : > { %657 = vmatprep.subr.bf16.mxu1 %v656_v16  ;;  %v261_v53 = vld [vmem:[%s1150_s1 + $0x270] sm:$0xff]  ;;  %v268_v55 = vld [vmem:[%s1150_s1 + $0x2a8] sm:$0xff]  ;;  %v270_v57 = vld [vmem:[%s1150_s1 + $0x2b8] sm:$0xff] }
  0x21   : > { %v670_v59 = vpack.c.bf16 %v261_v53, %v257_v51  ;;  %v608_v60 = vpack.c.bf16 %v268_v55, %v264_v54  ;;  %v263_v61 = vld [vmem:[%s1150_s1 + $0x280] sm:$0xff]  ;;  %v265_v63 = vld [vmem:[%s1150_s1 + $0x290] sm:$0xff]  ;;  %v672_v0 = vpack.c.bf16 %v270_v57, %v266_v56  ;;  %v272_v2 = vld [vmem:[%s1150_s1 + $0x2c8] sm:$0xff] }
  0x22   : > { %595 = vmatpush1.bf16.msra.mxu0 %v594_v22  ;;  %v267_v62 = vld [vmem:[%s1150_s1 + $0x2a0] sm:$0xff]  ;;  %v269_v1 = vld [vmem:[%s1150_s1 + $0x2b0] sm:$0xff]  ;;  %v276_v3 = vld [vmem:[%s1150_s1 + $0x2e8] sm:$0xff] }
  0x23   : > { %659 = vmatpush1.bf16.msra.mxu1 %v658_v23  ;;  %597 = vmatprep.subr.bf16.mxu0 %v596_v24  ;;  %v274_v4 = vld [vmem:[%s1150_s1 + $0x2d8] sm:$0xff]  ;;  %v610_v6 = vpack.c.bf16 %v267_v62, %v263_v61  ;;  %v271_v7 = vld [vmem:[%s1150_s1 + $0x2c0] sm:$0xff]  ;;  %v674_v8 = vpack.c.bf16 %v269_v1, %v265_v63  ;;  %v612_v9 = vpack.c.bf16 %v276_v3, %v272_v2  ;;  %v273_v11 = vld [vmem:[%s1150_s1 + $0x2d0] sm:$0xff] }
  0x24   : > { %661 = vmatprep.subr.bf16.mxu1 %v660_v28  ;;  %v278_v5 = vld [vmem:[%s1150_s1 + $0x2f8] sm:$0xff]  ;;  %v275_v10 = vld [vmem:[%s1150_s1 + $0x2e0] sm:$0xff]  ;;  %v277_v12 = vld [vmem:[%s1150_s1 + $0x2f0] sm:$0xff] }
  0x25   : > { %v676_v13 = vpack.c.bf16 %v278_v5, %v274_v4  ;;  %v280_v14 = vld [vmem:[%s1150_s1 + $0x308] sm:$0xff]  ;;  %v282_v17 = vld [vmem:[%s1150_s1 + $0x318] sm:$0xff]  ;;  %v614_v19 = vpack.c.bf16 %v275_v10, %v271_v7  ;;  %v678_v20 = vpack.c.bf16 %v277_v12, %v273_v11  ;;  %v279_v22 = vld [vmem:[%s1150_s1 + $0x300] sm:$0xff]  ;;  %v313_v4 = vlaneseq }
  0x26   : > { %599 = vmatpush1.bf16.msra.mxu0 %v598_v34  ;;  %v284_v15 = vld [vmem:[%s1150_s1 + $0x328] sm:$0xff]  ;;  %v286_v18 = vld [vmem:[%s1150_s1 + $0x338] sm:$0xff]  ;;  %v283_v23 = vld [vmem:[%s1150_s1 + $0x320] sm:$0xff] }
  0x27   : > { %663 = vmatpush1.bf16.msra.mxu1 %v662_v35  ;;  %601 = vmatprep.subr.bf16.mxu0 %v600_v36  ;;  %v180_v16 = vld [vmem:[%s1025_s26 + $0x8] sm:$0xff]  ;;  %v616_v21 = vpack.c.bf16 %v284_v15, %v280_v14  ;;  %v281_v24 = vld [vmem:[%s1150_s1 + $0x310] sm:$0xff]  ;;  %v680_v25 = vpack.c.bf16 %v286_v18, %v282_v17  ;;  %v290_v29 = vld [vmem:[%s1150_s1 + $0x358] sm:$0xff]  ;;  %v618_v31 = vpack.c.bf16 %v283_v23, %v279_v22  ;;  %v314_v5 = vshrl.u32 %v313_v4, 7 }
  0x28   : > { %665 = vmatprep.subr.bf16.mxu1 %v664_v40  ;;  %397 = vmatprep.mubr.f32.mxu0 %v180_v16  ;;  %v285_v26 = vld [vmem:[%s1150_s1 + $0x330] sm:$0xff]  ;;  %v288_v27 = vld [vmem:[%s1150_s1 + $0x348] sm:$0xff]  ;;  %v294_v30 = vld [vmem:[%s1150_s1 + $0x378] sm:$0xff] }
  0x29   : > { %474 = vmatprep.mubr.f32.mxu1 %v180_v16  ;;  %v292_v28 = vld [vmem:[%s1150_s1 + $0x368] sm:$0xff]  ;;  %v682_v32 = vpack.c.bf16 %v285_v26, %v281_v24  ;;  %v287_v34 = vld [vmem:[%s1150_s1 + $0x340] sm:$0xff]  ;;  %v289_v36 = vld [vmem:[%s1150_s1 + $0x350] sm:$0xff]  ;;  %v684_v37 = vpack.c.bf16 %v294_v30, %v290_v29  ;;  %v327_v10 = vsub.s32 3, %v314_v5 }
  0x2a   : > { %603 = vmatpush1.bf16.msra.mxu0 %v602_v46  ;;  %v620_v33 = vpack.c.bf16 %v292_v28, %v288_v27  ;;  %v291_v35 = vld [vmem:[%s1150_s1 + $0x360] sm:$0xff]  ;;  %v293_v38 = vld [vmem:[%s1150_s1 + $0x370] sm:$0xff]  ;;  %v296_v39 = vld [vmem:[%s1150_s1 + $0x388] sm:$0xff] }
  0x2b   : > { %667 = vmatpush1.bf16.msra.mxu1 %v666_v47  ;;  %605 = vmatprep.subr.bf16.mxu0 %v604_v48  ;;  %v300_v40 = vld [vmem:[%s1150_s1 + $0x3a8] sm:$0xff]  ;;  %v298_v41 = vld [vmem:[%s1150_s1 + $0x398] sm:$0xff]  ;;  %v622_v43 = vpack.c.bf16 %v291_v35, %v287_v34  ;;  %v686_v44 = vpack.c.bf16 %v293_v38, %v289_v36  ;;  %v295_v46 = vld [vmem:[%s1150_s1 + $0x380] sm:$0xff] }
  0x2c   : > { %669 = vmatprep.subr.bf16.mxu1 %v668_v52  ;;  %v302_v42 = vld [vmem:[%s1150_s1 + $0x3b8] sm:$0xff]  ;;  %v624_v45 = vpack.c.bf16 %v300_v40, %v296_v39  ;;  %v299_v47 = vld [vmem:[%s1150_s1 + $0x3a0] sm:$0xff]  ;;  %v297_v48 = vld [vmem:[%s1150_s1 + $0x390] sm:$0xff] }
  0x2d   : > { %v688_v49 = vpack.c.bf16 %v302_v42, %v298_v41  ;;  %v301_v50 = vld [vmem:[%s1150_s1 + $0x3b0] sm:$0xff]  ;;  %v304_v51 = vld [vmem:[%s1150_s1 + $0x3c8] sm:$0xff]  ;;  %v306_v53 = vld [vmem:[%s1150_s1 + $0x3d8] sm:$0xff]  ;;  %v626_v55 = vpack.c.bf16 %v299_v47, %v295_v46 }
  0x2e   : > { %607 = vmatpush1.bf16.msra.mxu0 %v606_v58  ;;  %v308_v52 = vld [vmem:[%s1150_s1 + $0x3e8] sm:$0xff]  ;;  %v310_v54 = vld [vmem:[%s1150_s1 + $0x3f8] sm:$0xff]  ;;  %v690_v56 = vpack.c.bf16 %v301_v50, %v297_v48  ;;  %v303_v58 = vld [vmem:[%s1150_s1 + $0x3c0] sm:$0xff] }
  0x2f   : > { %671 = vmatpush1.bf16.msra.mxu1 %v670_v59  ;;  %609 = vmatprep.subr.bf16.mxu0 %v608_v60  ;;  %v628_v57 = vpack.c.bf16 %v308_v52, %v304_v51  ;;  %v307_v59 = vld [vmem:[%s1150_s1 + $0x3e0] sm:$0xff]  ;;  %v692_v60 = vpack.c.bf16 %v310_v54, %v306_v53  ;;  %v305_v61 = vld [vmem:[%s1150_s1 + $0x3d0] sm:$0xff]  ;;  %v182_v2 = vld [vmem:[%s1025_s26 + $0x18] sm:$0xff] }
  0x30   : > { %673 = vmatprep.subr.bf16.mxu1 %v672_v0  ;;  %v309_v62 = vld [vmem:[%s1150_s1 + $0x3f0] sm:$0xff]  ;;  %v630_v63 = vpack.c.bf16 %v307_v59, %v303_v58  ;;  %v179_v1 = vld [vmem:[%s1025_s26] sm:$0xff] }
  0x31   : > { %v694_v0 = vpack.c.bf16 %v309_v62, %v305_v61  ;;  %v181_v3 = vld [vmem:[%s1025_s26 + $0x10] sm:$0xff]  ;;  %v311_v7 = vld [vmem:[%s1151_s2] sm:$0xf] }
  0x32   : > { %611 = vmatpush1.bf16.msra.mxu0 %v610_v6  ;;  %v315_v6 = vsub.s32 0, %v314_v5  ;;  %v328_v14 = vrot.slane %v311_v7, %v327_v10 }
  0x33   : > { %675 = vmatpush1.bf16.msra.mxu1 %v674_v8  ;;  %613 = vmatprep.subr.bf16.mxu0 %v612_v9  ;;  %v323_v8 = vsub.s32 2, %v314_v5  ;;  %v319_v9 = vsub.s32 1, %v314_v5 }
  0x34   : > { %677 = vmatprep.subr.bf16.mxu1 %v676_v13  ;;  %v316_v11 = vrot.slane %v311_v7, %v315_v6 }
  0x35   : > { %v324_v12 = vrot.slane %v311_v7, %v323_v8  ;;  %v320_v13 = vrot.slane %v311_v7, %v319_v9 }
  0x36   : > { %615 = vmatpush1.bf16.msra.mxu0 %v614_v19 }
  0x37   : > { %679 = vmatpush1.bf16.msra.mxu1 %v678_v20  ;;  %617 = vmatprep.subr.bf16.mxu0 %v616_v21 }
  0x38   : > { %681 = vmatprep.subr.bf16.mxu1 %v680_v25 }
  0x3a   : > { %619 = vmatpush1.bf16.msra.mxu0 %v618_v31 }
  0x3b   : > { %683 = vmatpush1.bf16.msra.mxu1 %v682_v32  ;;  %621 = vmatprep.subr.bf16.mxu0 %v620_v33 }
  0x3c   : > { %685 = vmatprep.subr.bf16.mxu1 %v684_v37 }
  0x3e   : > { %623 = vmatpush1.bf16.msra.mxu0 %v622_v43 }
  0x3f   : > { %687 = vmatpush1.bf16.msra.mxu1 %v686_v44  ;;  %625 = vmatprep.subr.bf16.mxu0 %v624_v45 }
  0x40   : > { %689 = vmatprep.subr.bf16.mxu1 %v688_v49 }
  0x42   : > { %627 = vmatpush1.bf16.msra.mxu0 %v626_v55 }
  0x43   : > { %691 = vmatpush1.bf16.msra.mxu1 %v690_v56  ;;  %629 = vmatprep.subr.bf16.mxu0 %v628_v57 }
  0x44   : > { %693 = vmatprep.subr.bf16.mxu1 %v692_v60 }
  0x46   : > { %631 = vmatpush1.bf16.msra.mxu0 %v630_v63 }
  0x47   : > { %695 = vmatpush1.bf16.msra.mxu1 %v694_v0 }
  0x49   : > { %398 = vmatmul.mubr.f32.vlgmr.msra.gmra.mrb[0].mxu0 %v179_v1 }
  0x4a   : > { %475 = vmatmul.mubr.f32.vlgmr.msra.gmra.mrb[0].mxu1 %v179_v1  ;;  %403 = vmatprep.mubr.f32.mxu0 %v182_v2 }
  0x4b   : > { %480 = vmatprep.mubr.f32.mxu1 %v182_v2 }
  0x4d   : > { %404 = vmatmul.mubr.f32.gmra.mrb[2].mxu0 %v181_v3 }
  0x4e   : > { %481 = vmatmul.mubr.f32.gmra.mrb[2].mxu1 %v181_v3 }
 0x11c   : > { %v399_v15 = vpop.f32.mrb[0].mxu0 }
 0x11d   : > { %v400_v16 = vadd.f32 %v399_v15, %v316_v11  ;;  %v476_v17 = vpop.f32.mrb[0].mxu1  ;;  %v401_v18 = vpop.f32.mrb[1].mxu0 }
 0x11e   : > { %v477_v19 = vadd.f32 %v476_v17, %v324_v12  ;;  %v402_v20 = vadd.f32 %v401_v18, %v320_v13  ;;  %v478_v21 = vpop.f32.mrb[1].mxu1 }
 0x11f   : > { %487 = vst [vmem:[%s177_s4] sm:$0xff] %v400_v16  ;;  %v479_v22 = vadd.f32 %v478_v21, %v328_v14 }
 0x120   : > { %489 = vst [vmem:[%s177_s4 + $0x10] sm:$0xff] %v477_v19  ;;  %488 = vst [vmem:[%s177_s4 + $0x8] sm:$0xff] %v402_v20  ;;  %v405_v23 = vpop.f32.mrb[2].mxu0 }
 0x121   : > { %490 = vst [vmem:[%s177_s4 + $0x18] sm:$0xff] %v479_v22  ;;  %v406_v24 = vadd.f32 %v405_v23, %v316_v11  ;;  %v482_v25 = vpop.f32.mrb[2].mxu1  ;;  %v407_v26 = vpop.f32.mrb[3].mxu0 }
 0x122   : > { %v483_v27 = vadd.f32 %v482_v25, %v324_v12  ;;  %v408_v28 = vadd.f32 %v407_v26, %v320_v13  ;;  %v484_v29 = vpop.f32.mrb[3].mxu1 }
 0x123   : > { %491 = vst [vmem:[%s177_s4 + $0x20] sm:$0xff] %v406_v24  ;;  %v485_v30 = vadd.f32 %v484_v29, %v328_v14 }
 0x124   : > { %493 = vst [vmem:[%s177_s4 + $0x30] sm:$0xff] %v483_v27  ;;  %492 = vst [vmem:[%s177_s4 + $0x28] sm:$0xff] %v408_v28 }
 0x125   : > { %494 = vst [vmem:[%s177_s4 + $0x38] sm:$0xff] %v485_v30 }
 0x126 PF: > { %s13_s12 = sadd.s32 1, %s710_s12  }
 0x127   : > { %p10_p4 = scmp.ge.s32.totalorder %s13_s12, 4  }
 0x129   :  { %12 = sbr.rel (!%p10_p4) target bundleno = 1 (0x1), region = 62 }

</bundles_post_ra>
